<compile_context>
chip_gen: v7x
topology: tpu7x:2x2x1
jax: 0.10.0
libtpu: 0.0.40
codegen_flags: <defaults>
</compile_context>

<pallas_src>
import functools

import jax
import jax.numpy as jnp
from jax import lax
from jax.experimental import pallas as pl
from jax.experimental.pallas import tpu as pltpu

CHN_AXIS = 1
CHN_NUM = 4
INT8_MAX = 127
INT8_MIN = -128


def _round_up(x, m):
    return (x + m - 1) // m * m


def _fake_quant_kernel(scales_sref, zp_sref, x_ref, o_ref, *,
                       num_channels, tile_rows):
    # Rebuild the per-row quant params every grid step (cheap: C static wheres
    # on a (tr,1) column).  row = n*C + c  ->  channel c = row % C.
    row0 = pl.program_id(0) * tile_rows
    row_idx = lax.broadcasted_iota(jnp.int32, (tile_rows, 1), 0) + row0
    chan = row_idx % num_channels

    inv = jnp.zeros((tile_rows, 1), jnp.float32)
    s = jnp.zeros((tile_rows, 1), jnp.float32)
    lo = jnp.zeros((tile_rows, 1), jnp.float32)
    hi = jnp.zeros((tile_rows, 1), jnp.float32)
    for c in range(num_channels):            # C is small and static
        m = chan == c
        sc = scales_sref[c]
        zc = zp_sref[c].astype(jnp.float32)
        inv = jnp.where(m, 1.0 / sc, inv)
        s = jnp.where(m, sc, s)
        lo = jnp.where(m, jnp.float32(INT8_MIN) - zc, lo)
        hi = jnp.where(m, jnp.float32(INT8_MAX) - zc, hi)

    x = x_ref[...]                           # (tr, cols) f32
    # zero point folded into the clamp bounds (numerically identical)
    q = jnp.clip(jnp.round(x * inv), lo, hi)  # jnp.round == ties-to-even (nearbyint)
    o_ref[...] = q * s


def fake_quantize_per_channel(x, scales, zero_points, *,
                              target_tile_bytes=2 << 20):
    """x: (N, C, H, W) f32; scales, zero_points: (C,). Channel axis = 1."""
    N, C, H, W = x.shape
    rows, cols = N * C, H * W
    x2d = x.reshape(rows, cols)              # free row-major view, no HBM pass

    # Full-width column blocks; pick tr (multiple of 8) so one buffer is
    # ~<=target_tile_bytes while still giving >=8 row tiles when possible
    # (megacore sharding on v7x).
    row_bytes = cols * 4
    tr_vmem = max(8, (target_tile_bytes // row_bytes) // 8 * 8)
    tr_par = max(8, _round_up(pl.cdiv(rows, 8), 8))
    tr = min(tr_vmem, tr_par, _round_up(rows, 8))
    grid = (pl.cdiv(rows, tr),)

    kernel = functools.partial(_fake_quant_kernel,
                               num_channels=C, tile_rows=tr)

    out2d = pl.pallas_call(
        kernel,
        out_shape=jax.ShapeDtypeStruct((rows, cols), jnp.float32),
        grid_spec=pltpu.PrefetchScalarGridSpec(
            num_scalar_prefetch=2,            # scales, zero_points -> SMEM
            grid=grid,
            # block last dim == full array dim -> no 128-divisibility issue,
            # fully contiguous HBM DMA per tile.
            in_specs=[pl.BlockSpec((tr, cols), lambda i, *_: (i, 0))],
            out_specs=pl.BlockSpec((tr, cols), lambda i, *_: (i, 0)),
        ),
        compiler_params=pltpu.CompilerParams(
            dimension_semantics=("parallel",)),
    )(scales.astype(jnp.float32), zero_points.astype(jnp.int32), x2d)

    return out2d.reshape(N, C, H, W)


if __name__ == "__main__":
    key = jax.random.PRNGKey(0)
    k_x, k_s, k_z = jax.random.split(key, 3)

    # torch.fake_quantize_per_channel_affine requires scale > 0, so the test
    # harness draws strictly-positive scales (the module's (randn-0.5)*0.05
    # init can produce invalid negative / near-zero scales).
    scales = jax.random.uniform(k_s, (CHN_NUM,), dtype=jnp.float32,
                                minval=0.005, maxval=0.055)
    zero_points = ((jax.random.normal(k_z, (CHN_NUM,), dtype=jnp.float32) - 0.5)
                   * 32).astype(jnp.int32)

    # input: R4 NCHW, channel axis = 1, C = CHN_NUM
    x = jax.random.normal(k_x, (2, CHN_NUM, 16, 16), dtype=jnp.float32)

    out = fake_quantize_per_channel(x, scales, zero_points)
    out = jax.block_until_ready(out)

    # pure-JAX reference mirroring torch.fake_quantize_per_channel_affine
    s = scales.reshape(1, CHN_NUM, 1, 1)
    zp = zero_points.astype(jnp.float32).reshape(1, CHN_NUM, 1, 1)
    q = jnp.clip(jnp.round(x * (1.0 / s)) + zp, INT8_MIN, INT8_MAX)
    ref = (q - zp) * s
    assert out.shape == x.shape and out.dtype == jnp.float32
    assert jnp.allclose(out, ref, atol=1e-5, rtol=1e-5)

    print("KERNEL_OK")
</pallas_src>

<mosaic_0001>
module attributes {stable_mosaic.version = 11 : i64} {
  func.func @_fake_quant_kernel(%arg0: i32, %arg1: memref<4xf32, #tpu.memory_space<smem>>, %arg2: memref<4xi32, #tpu.memory_space<smem>>, %arg3: memref<8x256xf32, #tpu.memory_space<vmem>>, %arg4: memref<8x256xf32, #tpu.memory_space<vmem>>) attributes {dimension_semantics = [#tpu.dimension_semantics<parallel>], iteration_bounds = array<i64: 1>, scalar_prefetch = 2 : i64, scratch_operands = 0 : i64, tpu.core_type = #tpu.core_type<tc>, window_params = [{transform_indices = @transform_0, window_bounds = array<i64: 8, 256>}, {transform_indices = @transform_1, window_bounds = array<i64: 8, 256>}]} {
    %c8_i32 = arith.constant 8 : i32
    %0 = arith.muli %arg0, %c8_i32 : i32
    %1 = tpu.iota {dimensions = array<i32: 0>} : vector<8x1xi32>
    %2 = vector.broadcast %0 : i32 to vector<8x1xi32>
    %3 = arith.addi %1, %2 : vector<8x1xi32>
    %c4_i32 = arith.constant 4 : i32
    %c0_i32 = arith.constant 0 : i32
    %4 = arith.cmpi eq, %c4_i32, %c0_i32 : i32
    %c1_i32 = arith.constant 1 : i32
    %5 = arith.select %4, %c1_i32, %c4_i32 : i32
    %6 = vector.broadcast %5 : i32 to vector<8x1xi32>
    %7 = arith.remsi %3, %6 : vector<8x1xi32>
    %c0_i32_0 = arith.constant 0 : i32
    %8 = vector.broadcast %c0_i32_0 : i32 to vector<8x1xi32>
    %9 = arith.cmpi ne, %7, %8 : vector<8x1xi32>
    %c0_i32_1 = arith.constant 0 : i32
    %10 = vector.broadcast %c0_i32_1 : i32 to vector<8x1xi32>
    %11 = arith.cmpi slt, %7, %10 : vector<8x1xi32>
    %c0_i32_2 = arith.constant 0 : i32
    %12 = arith.cmpi slt, %5, %c0_i32_2 : i32
    %13 = vector.broadcast %12 : i1 to vector<8x1xi1>
    %14 = vector.broadcast %13 : vector<8x1xi1> to vector<8x1xi1>
    %15 = arith.xori %11, %14 : vector<8x1xi1>
    %16 = arith.andi %15, %9 : vector<8x1xi1>
    %17 = vector.broadcast %5 : i32 to vector<8x1xi32>
    %18 = arith.addi %7, %17 : vector<8x1xi32>
    %19 = arith.select %16, %18, %7 : vector<8x1xi1>, vector<8x1xi32>
    %cst = arith.constant 0.000000e+00 : f32
    %20 = vector.broadcast %cst : f32 to vector<8x1xf32>
    %cst_3 = arith.constant 0.000000e+00 : f32
    %21 = vector.broadcast %cst_3 : f32 to vector<8x1xf32>
    %cst_4 = arith.constant 0.000000e+00 : f32
    %22 = vector.broadcast %cst_4 : f32 to vector<8x1xf32>
    %cst_5 = arith.constant 0.000000e+00 : f32
    %23 = vector.broadcast %cst_5 : f32 to vector<8x1xf32>
    %c0_i32_6 = arith.constant 0 : i32
    %24 = vector.broadcast %c0_i32_6 : i32 to vector<8x1xi32>
    %25 = arith.cmpi eq, %19, %24 : vector<8x1xi32>
    %c0 = arith.constant 0 : index
    %26 = memref.load %arg1[%c0] : memref<4xf32, #tpu.memory_space<smem>>
    %c0_7 = arith.constant 0 : index
    %27 = memref.load %arg2[%c0_7] : memref<4xi32, #tpu.memory_space<smem>>
    %28 = arith.sitofp %27 : i32 to f32
    %cst_8 = arith.constant 1.000000e+00 : f32
    %29 = arith.divf %cst_8, %26 : f32
    %30 = vector.broadcast %29 : f32 to vector<8x1xf32>
    %31 = arith.select %25, %30, %20 : vector<8x1xi1>, vector<8x1xf32>
    %32 = vector.broadcast %26 : f32 to vector<8x1xf32>
    %33 = arith.select %25, %32, %21 : vector<8x1xi1>, vector<8x1xf32>
    %cst_9 = arith.constant -1.280000e+02 : f32
    %34 = arith.subf %cst_9, %28 : f32
    %35 = vector.broadcast %34 : f32 to vector<8x1xf32>
    %36 = arith.select %25, %35, %22 : vector<8x1xi1>, vector<8x1xf32>
    %cst_10 = arith.constant 1.270000e+02 : f32
    %37 = arith.subf %cst_10, %28 : f32
    %38 = vector.broadcast %37 : f32 to vector<8x1xf32>
    %39 = arith.select %25, %38, %23 : vector<8x1xi1>, vector<8x1xf32>
    %c1_i32_11 = arith.constant 1 : i32
    %40 = vector.broadcast %c1_i32_11 : i32 to vector<8x1xi32>
    %41 = arith.cmpi eq, %19, %40 : vector<8x1xi32>
    %c1 = arith.constant 1 : index
    %42 = memref.load %arg1[%c1] : memref<4xf32, #tpu.memory_space<smem>>
    %c1_12 = arith.constant 1 : index
    %43 = memref.load %arg2[%c1_12] : memref<4xi32, #tpu.memory_space<smem>>
    %44 = arith.sitofp %43 : i32 to f32
    %cst_13 = arith.constant 1.000000e+00 : f32
    %45 = arith.divf %cst_13, %42 : f32
    %46 = vector.broadcast %45 : f32 to vector<8x1xf32>
    %47 = arith.select %41, %46, %31 : vector<8x1xi1>, vector<8x1xf32>
    %48 = vector.broadcast %42 : f32 to vector<8x1xf32>
    %49 = arith.select %41, %48, %33 : vector<8x1xi1>, vector<8x1xf32>
    %cst_14 = arith.constant -1.280000e+02 : f32
    %50 = arith.subf %cst_14, %44 : f32
    %51 = vector.broadcast %50 : f32 to vector<8x1xf32>
    %52 = arith.select %41, %51, %36 : vector<8x1xi1>, vector<8x1xf32>
    %cst_15 = arith.constant 1.270000e+02 : f32
    %53 = arith.subf %cst_15, %44 : f32
    %54 = vector.broadcast %53 : f32 to vector<8x1xf32>
    %55 = arith.select %41, %54, %39 : vector<8x1xi1>, vector<8x1xf32>
    %c2_i32 = arith.constant 2 : i32
    %56 = vector.broadcast %c2_i32 : i32 to vector<8x1xi32>
    %57 = arith.cmpi eq, %19, %56 : vector<8x1xi32>
    %c2 = arith.constant 2 : index
    %58 = memref.load %arg1[%c2] : memref<4xf32, #tpu.memory_space<smem>>
    %c2_16 = arith.constant 2 : index
    %59 = memref.load %arg2[%c2_16] : memref<4xi32, #tpu.memory_space<smem>>
    %60 = arith.sitofp %59 : i32 to f32
    %cst_17 = arith.constant 1.000000e+00 : f32
    %61 = arith.divf %cst_17, %58 : f32
    %62 = vector.broadcast %61 : f32 to vector<8x1xf32>
    %63 = arith.select %57, %62, %47 : vector<8x1xi1>, vector<8x1xf32>
    %64 = vector.broadcast %58 : f32 to vector<8x1xf32>
    %65 = arith.select %57, %64, %49 : vector<8x1xi1>, vector<8x1xf32>
    %cst_18 = arith.constant -1.280000e+02 : f32
    %66 = arith.subf %cst_18, %60 : f32
    %67 = vector.broadcast %66 : f32 to vector<8x1xf32>
    %68 = arith.select %57, %67, %52 : vector<8x1xi1>, vector<8x1xf32>
    %cst_19 = arith.constant 1.270000e+02 : f32
    %69 = arith.subf %cst_19, %60 : f32
    %70 = vector.broadcast %69 : f32 to vector<8x1xf32>
    %71 = arith.select %57, %70, %55 : vector<8x1xi1>, vector<8x1xf32>
    %c3_i32 = arith.constant 3 : i32
    %72 = vector.broadcast %c3_i32 : i32 to vector<8x1xi32>
    %73 = arith.cmpi eq, %19, %72 : vector<8x1xi32>
    %c3 = arith.constant 3 : index
    %74 = memref.load %arg1[%c3] : memref<4xf32, #tpu.memory_space<smem>>
    %c3_20 = arith.constant 3 : index
    %75 = memref.load %arg2[%c3_20] : memref<4xi32, #tpu.memory_space<smem>>
    %76 = arith.sitofp %75 : i32 to f32
    %cst_21 = arith.constant 1.000000e+00 : f32
    %77 = arith.divf %cst_21, %74 : f32
    %78 = vector.broadcast %77 : f32 to vector<8x1xf32>
    %79 = arith.select %73, %78, %63 : vector<8x1xi1>, vector<8x1xf32>
    %80 = vector.broadcast %74 : f32 to vector<8x1xf32>
    %81 = arith.select %73, %80, %65 : vector<8x1xi1>, vector<8x1xf32>
    %cst_22 = arith.constant -1.280000e+02 : f32
    %82 = arith.subf %cst_22, %76 : f32
    %83 = vector.broadcast %82 : f32 to vector<8x1xf32>
    %84 = arith.select %73, %83, %68 : vector<8x1xi1>, vector<8x1xf32>
    %cst_23 = arith.constant 1.270000e+02 : f32
    %85 = arith.subf %cst_23, %76 : f32
    %86 = vector.broadcast %85 : f32 to vector<8x1xf32>
    %87 = arith.select %73, %86, %71 : vector<8x1xi1>, vector<8x1xf32>
    %c0_24 = arith.constant 0 : index
    %c0_25 = arith.constant 0 : index
    %88 = vector.load %arg3[%c0_24, %c0_25] : memref<8x256xf32, #tpu.memory_space<vmem>>, vector<8x256xf32>
    %89 = vector.broadcast %79 : vector<8x1xf32> to vector<8x256xf32>
    %90 = arith.mulf %88, %89 : vector<8x256xf32>
    %91 = math.roundeven %90 : vector<8x256xf32>
    %92 = vector.broadcast %84 : vector<8x1xf32> to vector<8x256xf32>
    %93 = arith.maximumf %92, %91 : vector<8x256xf32>
    %94 = vector.broadcast %87 : vector<8x1xf32> to vector<8x256xf32>
    %95 = arith.minimumf %94, %93 : vector<8x256xf32>
    %96 = vector.broadcast %81 : vector<8x1xf32> to vector<8x256xf32>
    %97 = arith.mulf %95, %96 : vector<8x256xf32>
    %c0_26 = arith.constant 0 : index
    %c0_27 = arith.constant 0 : index
    %98 = vector.load %arg4[%c0_26, %c0_27] : memref<8x256xf32, #tpu.memory_space<vmem>>, vector<8x256xf32>
    tpu.vector_store %arg4[%c0_26, %c0_27], %97 {strides = array<i32>} : memref<8x256xf32, #tpu.memory_space<vmem>>, vector<8x256xf32>,
    return
  }
  func.func @transform_0(%arg0: i32, %arg1: memref<4xf32, #tpu.memory_space<smem>>, %arg2: memref<4xi32, #tpu.memory_space<smem>>) -> (i32, i32) {
    %c0_i32 = arith.constant 0 : i32
    %c0_i32_0 = arith.constant 0 : i32
    return %arg0, %c0_i32 : i32, i32
  }
  func.func @transform_1(%arg0: i32, %arg1: memref<4xf32, #tpu.memory_space<smem>>, %arg2: memref<4xi32, #tpu.memory_space<smem>>) -> (i32, i32) {
    %c0_i32 = arith.constant 0 : i32
    %c0_i32_0 = arith.constant 0 : i32
    return %arg0, %c0_i32 : i32, i32
  }
}

</mosaic_0001>

<bundles_post_ra>
// kernel: tpu_custom_call.1
= control target key start
LH: loop header
LB: loop body
LE: loop exit
PB: predicated region body
PF: predicated region fallthrough
CT: control target
= control target key end

     0   :  { %s350_s0 = inlined_call_operand.hbm [shape: f32[4], index: 0, kind: input, shape index: {}]   ;;  %s351_s2 = inlined_call_operand.hbm [shape: f32[8,256], index: 2, kind: input, shape index: {}]   ;;  %s352_s3 = inlined_call_operand.hbm [shape: f32[8,256], index: 3, kind: output, shape index: {}]   ;;  %s353_s1 = inlined_call_operand.vmem [shape: s32[4], index: 1, kind: input, shape index: {}]  }
   0x1   :  { %s173_s14 = scalar_lea.hbm %s350_s0, 16 }
   0x2   :  { %p174_p0 = scmp.ne.s32.totalorder %s350_s0, %s173_s14  ;;  %p177_p1 = scmp.lt.u32.totalorder %s173_s14, %s350_s0 }
   0x4   :  { %p179_p2 = pnand %p177_p1, %p174_p0 }
   0x6   :  { %182 = shalt.err (!%p179_p2)  }
   0x7   :  { %s245_s19 = smov [#allocation3]   ;;  %s10_s24 = sshll.u32 %s353_s1, 4  ;;  %s11_s24 = int_to_ptr.vmem [resolvable:$true] %s10_s24 }
   0x8   :  { %9 = dma.hbm_to_smem %s350_s0, 16, %s245_s19, [#allocation2] }
   0x9   :  { %s183_s25 = scalar_lea.vmem %s11_s24, 16  ;;  %p188_p4 = scmp.lt.s32.totalorder %s11_s24, %s11_s24 }
   0xa   :  { %p184_p3 = scmp.ne.s32.totalorder %s11_s24, %s183_s25  ;;  %p189_p5 = scmp.lt.s32.totalorder %s183_s25, %s183_s25 }
   0xc   :  { %p190_p6 = por %p189_p5, %p188_p4 }
   0xe   :  { %p191_p7 = pnand %p190_p6, %p184_p3 }
  0x10   :  { %194 = shalt.err (!%p191_p7)  }
  0x11   :  { %s246_s26 = smov [#allocation4]  }
  0x12   :  { %13 = dma.vmem_to_smem %s11_s24, 16, %s246_s26, [#allocation2] }
  0x13   :  { %239 = dma.done.wait [#allocation2], 32 }
  0x14   :  { %240 = vsyncadd [#allocation2], 4294967264 }
  0x15   :  { %15 = sfence }
  0x16   :  { %16 = vsyncpa [#allocation6], 0 }
  0x17   :  { %17 = vsyncpa [#allocation7], 0  ;;  %s247_s0 = smov [#allocation5]   ;;  %s195_s29 = scalar_lea.hbm %s351_s2, 256 }
  0x18   :  { %s24_s27 = sshll.u32 %s247_s0, 4  ;;  %p196_p8 = scmp.ne.s32.totalorder %s351_s2, %s195_s29  ;;  %s25_s27 = int_to_ptr.vmem [resolvable:$true] %s24_s27 }
  0x19   :  { %p199_p9 = scmp.lt.u32.totalorder %s195_s29, %s351_s2 }
  0x1b   :  { %p201_p10 = pnand %p199_p9, %p196_p8 }
  0x1d   :  { %204 = shalt.err (!%p201_p10)
}
  0x1e   :  { %s205_s7 = scalar_lea.vmem %s25_s27, 256  ;;  %p210_p12 = scmp.lt.s32.totalorder %s25_s27, %s25_s27 }
  0x1f   :  { %p206_p11 = scmp.ne.s32.totalorder %s25_s27, %s205_s7  ;;  %p211_p13 = scmp.lt.s32.totalorder %s205_s7, %s205_s7 }
  0x21   :  { %p212_p0 = por %p211_p13, %p210_p12 }
  0x23   :  { %p213_p1 = pnand %p212_p0, %p206_p11 }
  0x25   :  { %216 = shalt.err (!%p213_p1)
}
  0x26   :  { %27 = dma.hbm_to_vmem [thread:$0]  %s351_s2, 256, %s25_s27, [#allocation6]  }
  0x27   :  { %241 = dma.done.wait [#allocation6], 256  }
  0x28   :  { %242 = vsyncadd [#allocation6], 4294967040  ;;  %v32_v0 = vlaneseq  ;;  %s49_s10 = sld [smem:[#allocation3]]  ;;  %s145_s11 = sld [smem:[#allocation3 + $0x1]]  ;;  %v116_v28 = vld [vmem:[#allocation5] sm:$0xff]  ;;  %v117_v29 = vld [vmem:[#allocation5 + $0x8] sm:$0xff] }
  0x29   :  { %s147_s12 = sld [smem:[#allocation3 + $0x2]]  ;;  %s149_s13 = sld [smem:[#allocation3 + $0x3]] }
  0x2a   :  { %v33_v1 = vshrl.u32 %v32_v0, 7  ;;  %s50_s2 = sld [smem:[#allocation4]]  ;;  %s146_s14 = sld [smem:[#allocation4 + $0x1]] }
  0x2b   :  { %s148_s15 = sld [smem:[#allocation4 + $0x2]]  ;;  %s150_s17 = sld [smem:[#allocation4 + $0x3]] }
  0x2c   :  { %v296_v2 = vand.u32 3, %v33_v1  ;;  %s248_s4 = smov [#allocation8]  }
  0x2d   :  { %s136_s5 = sshll.u32 %s248_s4, 4  ;;  %s137_s5 = int_to_ptr.vmem [resolvable:$true] %s136_s5 }
  0x2e   :  { %vm48_vm0 = vcmp.eq.s32.totalorder %v296_v2, 0  ;;  %v52_v3 = vstv %s49_s10  ;;  %vm65_vm1 = vcmp.eq.s32.totalorder %v296_v2, 1  ;;  %v69_v5 = vstv %s145_s11  ;;  %s217_s6 = scalar_lea.vmem %s137_s5, 256  ;;  %p222_p3 = scmp.lt.s32.totalorder %s137_s5, %s137_s5 }
  0x2f   :  { %165 = vrcp.f32 %v52_v3  ;;  %v58_v4 = vsel %vm48_vm0, %v52_v3, 0.0  ;;  %v86_v6 = vstv %s147_s12  ;;  %v103_v8 = vstv %s149_s13  ;;  %p218_p2 = scmp.ne.s32.totalorder %s137_s5, %s217_s6  ;;  %p223_p4 = scmp.lt.s32.totalorder %s217_s6, %s217_s6 }
  0x30   :  { %167 = vrcp.f32 %v69_v5  ;;  %v75_v7 = vsel %vm65_vm1, %v69_v5, %v58_v4  ;;  %vm82_vm2 = vcmp.eq.s32.totalorder %v296_v2, 2  ;;  %vm99_vm3 = vcmp.eq.s32.totalorder %v296_v2, 3  ;;  %s51_s16 = scvt.s32.f32 %s50_s2  ;;  %s68_s18 = scvt.s32.f32 %s146_s14 }
  0x31   :  { %169 = vrcp.f32 %v86_v6  ;;  %v92_v9 = vsel %vm82_vm2, %v86_v6, %v75_v7  ;;  %s85_s21 = scvt.s32.f32 %s148_s15  ;;  %s102_s23 = scvt.s32.f32 %s150_s17 }
  0x32   :  { %171 = vrcp.f32 %v103_v8  ;;  %v310_v10 = vsel %vm99_vm3, %v103_v8, %v92_v9  ;;  %s59_s19 = ssub.f32 -128.0, %s51_s16  ;;  %p224_p5 = por %p223_p4, %p222_p3 }
  0x33   :  { %s62_s20 = ssub.f32 127.0, %s51_s16 }
  0x34   :  { %s76_s22 = ssub.f32 -128.0, %s68_s18  ;;  %v60_v15 = vstv %s59_s19  ;;  %p225_p6 = pnand %p224_p5, %p218_p2 }
  0x35   :  { %s79_s24 = ssub.f32 127.0, %s68_s18  ;;  %v63_v16 = vstv %s62_s20  ;;  %v61_v17 = vsel %vm48_vm0, %v60_v15, 0.0 }
  0x36   :  { %s93_s25 = ssub.f32 -128.0, %s85_s21  ;;  %v77_v18 = vstv %s76_s22  ;;  %v64_v19 = vsel %vm48_vm0, %v63_v16, 0.0 }
  0x37   :  { %s96_s26 = ssub.f32 127.0, %s85_s21  ;;  %v80_v20 = vstv %s79_s24  ;;  %v78_v22 = vsel %vm65_vm1, %v77_v18, %v61_v17 }
  0x38   :  { %s110_s27 = ssub.f32 -128.0, %s102_s23  ;;  %v94_v23 = vstv %s93_s25  ;;  %v81_v30 = vsel %vm65_vm1, %v80_v20, %v64_v19 }
  0x39   :  { %v166_v11 = vpop.eup %165  ;;  %s113_s29 = ssub.f32 127.0, %s102_s23  ;;  %v97_v31 = vstv %s96_s26  ;;  %v95_v33 = vsel %vm82_vm2, %v94_v23, %v78_v22 }
  0x3a   :  { %v168_v12 = vpop.eup %167  ;;  %151 = vpush %v166_v11  ;;  %v111_v35 = vstv %s110_s27  ;;  %v98_v39 = vsel %vm82_vm2, %v97_v31, %v81_v30 }
  0x3b   :  { %v170_v13 = vpop.eup %169  ;;  %153 = vpush %v168_v12  ;;  %v114_v40 = vstv %s113_s29  ;;  %v112_v41 = vsel %vm99_vm3, %v111_v35, %v95_v33 }
  0x3c   :  { %v172_v14 = vpop.eup %171  ;;  %155 = vpush %v170_v13  ;;  %v115_v44 = vsel %vm99_vm3, %v114_v40, %v98_v39 }
  0x3d   :  { %157 = vpush %v172_v14 }
  0x6b   :  { %s152_s0 = spop %151 }
  0x6c   :  { %v55_v21 = vstv %s152_s0  ;;  %s154_s28 = spop %153 }
  0x6d   :  { %v56_v24 = vsel %vm48_vm0, %v55_v21, 0.0  ;;  %v72_v25 = vstv %s154_s28  ;;  %s156_s1 = spop %155 }
  0x6e   :  { %v73_v26 = vsel %vm65_vm1, %v72_v25, %v56_v24  ;;  %v89_v27 = vstv %s156_s1  ;;  %s158_s30 = spop %157 }
  0x6f   :  { %v90_v32 = vsel %vm82_vm2, %v89_v27, %v73_v26  ;;  %v106_v34 = vstv %s158_s30 }
  0x70   :  { %v107_v36 = vsel %vm99_vm3, %v106_v34, %v90_v32 }
  0x71   :  { %v118_v37 = vmul.f32 %v116_v28, %v107_v36  ;;  %v119_v38 = vmul.f32 %v117_v29, %v107_v36 }
  0x73   :  { %v159_v42 = vround.rtne.f32 %v118_v37  ;;  %v160_v43 = vround.rtne.f32 %v119_v38 }
  0x75   :  { %v122_v45 = vmax.f32 %v112_v41, %v159_v42  ;;  %v123_v46 = vmax.f32 %v112_v41, %v160_v43 }
  0x77   :  { %v124_v47 = vmin.f32 %v115_v44, %v122_v45  ;;  %v125_v48 = vmin.f32 %v115_v44, %v123_v46 }
  0x79   :  { %v126_v49 = vmul.f32 %v124_v47, %v310_v10  ;;  %v127_v50 = vmul.f32 %v125_v48, %v310_v10 }
  0x7b   :  { %128 = vst [vmem:[#allocation8] sm:$0xff] %v126_v49  ;;  %129 = vst [vmem:[#allocation8 + $0x8] sm:$0xff] %v127_v50 }
  0x7c   :  { %228 = shalt.err (!%p225_p6)
}
  0x7d   :  { %s229_s9 = scalar_lea.hbm %s352_s3, 256 }
  0x7e   :  { %p230_p7 = scmp.ne.s32.totalorder %s352_s3, %s229_s9  ;;  %p233_p8 = scmp.lt.u32.totalorder %s229_s9, %s352_s3 }
  0x80   :  { %p235_p9 = pnand %p233_p8, %p230_p7 }
  0x82   :  { %238 = shalt.err (!%p235_p9)
}
  0x83   :  { %139 = dma.vmem_to_hbm [thread:$0]  %s137_s5, 256, %s352_s3, [#allocation7]  }
  0x84   :  { %243 = dma.done.wait [#allocation7], 256  }
  0x85   :  { %244 = vsyncadd [#allocation7], 4294967040 }
  0x86   :  { %143 = vsyncpa [#allocation6], 1 }
  0x87   :  { %144 = vsyncpa [#allocation7], 1 }

</bundles_post_ra>
